<compile_context>
chip_gen: v7x
topology: tpu7x:2x2x1
jax: 0.10.0
libtpu: 0.0.40
codegen_flags: <defaults>
</compile_context>

<pallas_src>
import functools

import jax
import jax.numpy as jnp
from jax import lax
from jax.experimental import pallas as pl
from jax.experimental.pallas import tpu as pltpu


def _match_assignment_kernel(d0_ref, d1_ref, wpT_ref, bp_ref, wmT_ref, bm_ref,
                             scores_ref, z0_ref, z1_ref,
                             md1_ref, colmax_ref, colsum_ref,
                             *, normalize_descriptors):
    f32 = jnp.float32
    p = pl.program_id(1)   # 0 = column-stat accumulation pass, 1 = emit pass
    t = pl.program_id(2)   # m-tile index

    wpT = wpT_ref[...]     # (D, D) pre-transposed (in, out), scale folded
    bp = bp_ref[...]       # (1, D) f32, scale folded
    wmT = wmT_ref[...]     # (D, 1)
    bm = bm_ref[0]         # scalar matchability bias (SMEM)

    cdot = (((1,), (0,)), ((), ()))   # plain (.., K) @ (K, ..) contraction

    def project(x):  # x: (L, D) in descriptor dtype -> (L, D) in descriptor dtype
        md = lax.dot_general(x, wpT, cdot, preferred_element_type=f32) + bp
        if normalize_descriptors:
            md = 20.0 * md * lax.rsqrt(jnp.sum(md * md, axis=-1, keepdims=True))
        return md.astype(x.dtype)

    # Per-batch init: project desc1 once, reset column accumulators, emit z1.
    @pl.when(jnp.logical_and(p == 0, t == 0))
    def _():
        d1 = d1_ref[0]                                       # (N, D)
        md1_ref[...] = project(d1)
        colmax_ref[...] = jnp.full(colmax_ref.shape, -jnp.inf, dtype=colmax_ref.dtype)
        colsum_ref[...] = jnp.zeros(colsum_ref.shape, dtype=colsum_ref.dtype)
        z1 = lax.dot_general(d1, wmT, cdot, preferred_element_type=f32) + bm
        z1_ref[0] = z1.astype(z1_ref.dtype)

    d0 = d0_ref[0]                                           # (TM, D)
    md0 = project(d0)                                        # (TM, D)
    # sim[m, n] = <md0[m], md1[n]>  (A @ B^T on the MXU, f32 accumulation)
    sim = lax.dot_general(md0, md1_ref[...], (((1,), (1,)), ((), ())),
                          preferred_element_type=f32)        # (TM, N) f32

    @pl.when(p == 0)
    def _():
        # Running column max / sum-exp (flash-style rescaling), (1, N) scratch.
        tile_max = jnp.max(sim, axis=0, keepdims=True)
        new_max = jnp.maximum(colmax_ref[...], tile_max)
        colsum_ref[...] = (colsum_ref[...] * jnp.exp(colmax_ref[...] - new_max)
                           + jnp.sum(jnp.exp(sim - new_max), axis=0, keepdims=True))
        colmax_ref[...] = new_max

    @pl.when(p == 1)
    def _():
        row_max = jnp.max(sim, axis=1, keepdims=True)                       # (TM, 1)
        row_lse = row_max + jnp.log(
            jnp.sum(jnp.exp(sim - row_max), axis=1, keepdims=True))
        col_lse = colmax_ref[...] + jnp.log(colsum_ref[...])                # (1, N)
        scores_ref[0] = (2.0 * sim - row_lse - col_lse).astype(scores_ref.dtype)
        z0 = lax.dot_general(d0, wmT, cdot, preferred_element_type=f32) + bm
        z0_ref[0] = z0.astype(z0_ref.dtype)


def match_assignment(desc0, desc1, proj_w, proj_b, match_w, match_b,
                     *, normalize_descriptors=False, tm=128):
    """Equivalent to MatchAssignment.forward(desc0, desc1) (no masks).

    desc0: [B, M, D], desc1: [B, N, D]
    proj_w: [D, D], proj_b: [D]     (final_proj, PyTorch layout (out, in))
    match_w: [1, D], match_b: [1]   (matchability)
    Returns (scores [B, M, N], z0 [B, M, 1], z1 [B, N, 1]).
    """
    B, M, D = desc0.shape
    Bn, N, Dn = desc1.shape
    assert B == Bn and D == Dn

    tm = min(tm, M)
    assert M % tm == 0, "M must be divisible by the m-tile size"
    assert tm == M or tm % 8 == 0, "m-tile must be a multiple of 8 (or the full M)"
    n_mt = M // tm

    cdtype = desc0.dtype  # keep MXU operands in the descriptor dtype (bf16-friendly)

    # Pre-transpose final_proj weight to (D_in, D_out); fold d**-0.25 into W, b
    # (non-normalized path) so the kernel never rescales (M,D)/(N,D) activations.
    wpT = jnp.asarray(proj_w, jnp.float32).T
    bp = jnp.asarray(proj_b, jnp.float32).reshape(1, D)
    if not normalize_descriptors:
        scale = float(D) ** -0.25
        wpT = wpT * scale
        bp = bp * scale
    wpT = wpT.astype(cdtype)
    wmT = jnp.asarray(match_w, jnp.float32).reshape(1, D).T.astype(cdtype)   # (D, 1)
    bm = jnp.asarray(match_b, jnp.float32).reshape(1)                        # SMEM scalar

    out_dtype = cdtype
    kernel = functools.partial(_match_assignment_kernel,
                               normalize_descriptors=normalize_descriptors)

    scores, z0, z1 = pl.pallas_call(
        kernel,
        out_shape=(
            jax.ShapeDtypeStruct((B, M, N), out_dtype),
            jax.ShapeDtypeStruct((B, M, 1), out_dtype),
            jax.ShapeDtypeStruct((B, N, 1), out_dtype),
        ),
        grid_spec=pltpu.PrefetchScalarGridSpec(
            num_scalar_prefetch=0,
            grid=(B, 2, n_mt),                                   # batch, pass, m-tile
            in_specs=[
                pl.BlockSpec((1, tm, D), lambda b, p, t: (b, t, 0)),     # desc0 tile
                pl.BlockSpec((1, N, D), lambda b, p, t: (b, 0, 0)),      # desc1 (per batch)
                pl.BlockSpec((D, D), lambda b, p, t: (0, 0)),            # proj weight^T
                pl.BlockSpec((1, D), lambda b, p, t: (0, 0)),            # proj bias
                pl.BlockSpec((D, 1), lambda b, p, t: (0, 0)),            # matchability w^T
                pl.BlockSpec(memory_space=pltpu.MemorySpace.SMEM),       # matchability bias
            ],
            out_specs=(
                # Pinned to block 0 during pass 0 (never written there), streamed in pass 1.
                pl.BlockSpec((1, tm, N), lambda b, p, t: (b, p * t, 0)),  # scores
                pl.BlockSpec((1, tm, 1), lambda b, p, t: (b, p * t, 0)),  # z0
                pl.BlockSpec((1, N, 1), lambda b, p, t: (b, 0, 0)),       # z1 (per batch)
            ),
            scratch_shapes=[
                pltpu.VMEM((N, D), cdtype),        # projected desc1 (per batch)
                pltpu.VMEM((1, N), jnp.float32),   # running column max
                pltpu.VMEM((1, N), jnp.float32),   # running column sum-exp
            ],
        ),
        compiler_params=pltpu.CompilerParams(
            dimension_semantics=("parallel", "arbitrary", "arbitrary"),
            vmem_limit_bytes=48 * 1024 * 1024,
        ),
    )(desc0, desc1, wpT, bp, wmT, bm)

    return scores, z0, z1


if __name__ == "__main__":
    key = jax.random.PRNGKey(0)
    k0, k1, kwp, kbp, kwm, kbm = jax.random.split(key, 6)

    B, M, N, D = 2, 16, 24, 32   # small shapes; tm=8 exercises 2 m-tiles per batch

    desc0 = jax.random.normal(k0, (B, M, D), dtype=jnp.float32)
    desc1 = jax.random.normal(k1, (B, N, D), dtype=jnp.float32)

    # PyTorch-style nn.Linear init: U(-1/sqrt(in), 1/sqrt(in))
    bound = float(D) ** -0.5
    proj_w = jax.random.uniform(kwp, (D, D), jnp.float32, -bound, bound)
    proj_b = jax.random.uniform(kbp, (D,), jnp.float32, -bound, bound)
    match_w = jax.random.uniform(kwm, (1, D), jnp.float32, -bound, bound)
    match_b = jax.random.uniform(kbm, (1,), jnp.float32, -bound, bound)

    scores, z0, z1 = match_assignment(desc0, desc1, proj_w, proj_b,
                                      match_w, match_b, tm=8)
    jax.block_until_ready((scores, z0, z1))

    # Plain-JAX reference (exact f32 matmuls)
    hp = jax.lax.Precision.HIGHEST
    md0 = jnp.einsum("bmd,ed->bme", desc0, proj_w, precision=hp) + proj_b
    md1 = jnp.einsum("bnd,ed->bne", desc1, proj_w, precision=hp) + proj_b
    md0 = md0 / D ** 0.25
    md1 = md1 / D ** 0.25
    sim = jnp.einsum("bmd,bnd->bmn", md0, md1, precision=hp)
    ref_scores = jax.nn.log_softmax(sim, axis=2) + jax.nn.log_softmax(sim, axis=1)
    ref_z0 = jnp.einsum("bmd,od->bmo", desc0, match_w, precision=hp) + match_b
    ref_z1 = jnp.einsum("bnd,od->bno", desc1, match_w, precision=hp) + match_b

    assert scores.shape == (B, M, N)
    assert z0.shape == (B, M, 1) and z1.shape == (B, N, 1)
    assert jnp.allclose(scores, ref_scores, atol=1e-2, rtol=1e-2)
    assert jnp.allclose(z0, ref_z0, atol=1e-2, rtol=1e-2)
    assert jnp.allclose(z1, ref_z1, atol=1e-2, rtol=1e-2)

    print("KERNEL_OK")
</pallas_src>

<mosaic_0001>
module attributes {stable_mosaic.version = 11 : i64} {
  func.func @_match_assignment_kernel(%arg0: i32, %arg1: i32, %arg2: i32, %arg3: memref<1x8x32xf32, #tpu.memory_space<vmem>>, %arg4: memref<1x24x32xf32, #tpu.memory_space<vmem>>, %arg5: memref<32x32xf32, #tpu.memory_space<vmem>>, %arg6: memref<1x32xf32, #tpu.memory_space<vmem>>, %arg7: memref<32x1xf32, #tpu.memory_space<vmem>>, %arg8: memref<1xf32, #tpu.memory_space<smem>>, %arg9: memref<1x8x24xf32, #tpu.memory_space<vmem>>, %arg10: memref<1x8x1xf32, #tpu.memory_space<vmem>>, %arg11: memref<1x24x1xf32, #tpu.memory_space<vmem>>, %arg12: memref<24x32xf32, #tpu.memory_space<vmem>>, %arg13: memref<1x24xf32, #tpu.memory_space<vmem>>, %arg14: memref<1x24xf32, #tpu.memory_space<vmem>>) attributes {dimension_semantics = [#tpu.dimension_semantics<parallel>, #tpu.dimension_semantics<arbitrary>, #tpu.dimension_semantics<arbitrary>], iteration_bounds = array<i64: 2, 2, 2>, scalar_prefetch = 0 : i64, scratch_operands = 3 : i64, tpu.core_type = #tpu.core_type<tc>, window_params = [{transform_indices = @transform_0, window_bounds = array<i64: 1, 8, 32>}, {transform_indices = @transform_1, window_bounds = array<i64: 1, 24, 32>}, {pipeline_mode = #tpu.pipeline_mode<synchronous>, transform_indices = @transform_2, window_bounds = array<i64: 32, 32>}, {pipeline_mode = #tpu.pipeline_mode<synchronous>, transform_indices = @transform_3, window_bounds = array<i64: 1, 32>}, {pipeline_mode = #tpu.pipeline_mode<synchronous>, transform_indices = @transform_4, window_bounds = array<i64: 32, 1>}, {transform_indices = @transform_5, window_bounds = array<i64: 1>}, {transform_indices = @transform_6, window_bounds = array<i64: 1, 8, 24>}, {transform_indices = @transform_7, window_bounds = array<i64: 1, 8, 1>}, {transform_indices = @transform_8, window_bounds = array<i64: 1, 24, 1>}]} {
    %c0 = arith.constant 0 : index
    %c0_0 = arith.constant 0 : index
    %0 = vector.load %arg5[%c0, %c0_0] : memref<32x32xf32, #tpu.memory_space<vmem>>, vector<32x32xf32>
    %c0_1 = arith.constant 0 : index
    %c0_2 = arith.constant 0 : index
    %1 = vector.load %arg6[%c0_1, %c0_2] : memref<1x32xf32, #tpu.memory_space<vmem>>, vector<1x32xf32>
    %c0_3 = arith.constant 0 : index
    %c0_4 = arith.constant 0 : index
    %2 = vector.load %arg7[%c0_3, %c0_4] : memref<32x1xf32, #tpu.memory_space<vmem>>, vector<32x1xf32>
    %c0_5 = arith.constant 0 : index
    %3 = memref.load %arg8[%c0_5] : memref<1xf32, #tpu.memory_space<smem>>
    %c0_i32 = arith.constant 0 : i32
    %4 = arith.cmpi eq, %arg1, %c0_i32 : i32
    %c0_i32_6 = arith.constant 0 : i32
    %5 = arith.cmpi eq, %arg2, %c0_i32_6 : i32
    %6 = arith.andi %4, %5 : i1
    %7 = arith.extui %6 : i1 to i32
    %c0_i32_7 = arith.constant 0 : i32
    %8 = arith.cmpi ne, %7, %c0_i32_7 : i32
    scf.if %8 {
      %c0_17 = arith.constant 0 : index
      %c0_18 = arith.constant 0 : index
      %c0_19 = arith.constant 0 : index
      %22 = vector.load %arg4[%c0_17, %c0_18, %c0_19] : memref<1x24x32xf32, #tpu.memory_space<vmem>>, vector<1x24x32xf32>
      %23 = vector.shape_cast %22 : vector<1x24x32xf32> to vector<24x32xf32>
      %cst_20 = arith.constant dense<0.000000e+00> : vector<24x32xf32>
      %24 = tpu.matmul %23, %0, %cst_20 {dimension_numbers = #tpu.dot_dimension_numbers<[1], [0], [0], [1], [0, 0, 1, 1], [], []>} : vector<24x32xf32>, vector<32x32xf32>, vector<24x32xf32> -> vector<24x32xf32>
      %25 = vector.broadcast %1 : vector<1x32xf32> to vector<24x32xf32>
      %26 = arith.addf %24, %25 : vector<24x32xf32>
      %c0_21 = arith.constant 0 : index
      %c0_22 = arith.constant 0 : index
      %27 = vector.load %arg12[%c0_21, %c0_22] : memref<24x32xf32, #tpu.memory_space<vmem>>, vector<24x32xf32>
      tpu.vector_store %arg12[%c0_21, %c0_22], %26 {strides = array<i32>} : memref<24x32xf32, #tpu.memory_space<vmem>>, vector<24x32xf32>,
      %cst_23 = arith.constant 0xFF800000 : f32
      %28 = vector.broadcast %cst_23 : f32 to vector<1x24xf32>
      %c0_24 = arith.constant 0 : index
      %c0_25 = arith.constant 0 : index
      %29 = vector.load %arg13[%c0_24, %c0_25] : memref<1x24xf32, #tpu.memory_space<vmem>>, vector<1x24xf32>
      tpu.vector_store %arg13[%c0_24, %c0_25], %28 {strides = array<i32>} : memref<1x24xf32, #tpu.memory_space<vmem>>, vector<1x24xf32>,
      %cst_26 = arith.constant 0.000000e+00 : f32
      %30 = vector.broadcast %cst_26 : f32 to vector<1x24xf32>
      %c0_27 = arith.constant 0 : index
      %c0_28 = arith.constant 0 : index
      %31 = vector.load %arg14[%c0_27, %c0_28] : memref<1x24xf32, #tpu.memory_space<vmem>>, vector<1x24xf32>
      tpu.vector_store %arg14[%c0_27, %c0_28], %30 {strides = array<i32>} : memref<1x24xf32, #tpu.memory_space<vmem>>, vector<1x24xf32>,
      %cst_29 = arith.constant dense<0.000000e+00> : vector<24x1xf32>
      %32 = tpu.matmul %23, %2, %cst_29 {dimension_numbers = #tpu.dot_dimension_numbers<[1], [0], [0], [1], [0, 0, 1, 1], [], []>} : vector<24x32xf32>, vector<32x1xf32>, vector<24x1xf32> -> vector<24x1xf32>
      %33 = vector.broadcast %3 : f32 to vector<24x1xf32>
      %34 = arith.addf %32, %33 : vector<24x1xf32>
      %c0_30 = arith.constant 0 : index
      %c0_31 = arith.constant 0 : index
      %c0_32 = arith.constant 0 : index
      %35 = vector.load %arg11[%c0_30, %c0_31, %c0_32] : memref<1x24x1xf32, #tpu.memory_space<vmem>>, vector<1x24x1xf32>
      %36 = vector.shape_cast %35 : vector<1x24x1xf32> to vector<24x1xf32>
      %37 = vector.shape_cast %34 : vector<24x1xf32> to vector<1x24x1xf32>
      tpu.vector_store %arg11[%c0_30, %c0_31, %c0_32], %37 {strides = array<i32>} : memref<1x24x1xf32, #tpu.memory_space<vmem>>, vector<1x24x1xf32>,
    } else {
    }
    %c0_8 = arith.constant 0 : index
    %c0_9 = arith.constant 0 : index
    %c0_10 = arith.constant 0 : index
    %9 = vector.load %arg3[%c0_8, %c0_9, %c0_10] : memref<1x8x32xf32, #tpu.memory_space<vmem>>, vector<1x8x32xf32>
    %10 = vector.shape_cast %9 : vector<1x8x32xf32> to vector<8x32xf32>
    %cst = arith.constant dense<0.000000e+00> : vector<8x32xf32>
    %11 = tpu.matmul %10, %0, %cst {dimension_numbers = #tpu.dot_dimension_numbers<[1], [0], [0], [1], [0, 0, 1, 1], [], []>} : vector<8x32xf32>, vector<32x32xf32>, vector<8x32xf32> -> vector<8x32xf32>
    %12 = vector.broadcast %1 : vector<1x32xf32> to vector<8x32xf32>
    %13 = arith.addf %11, %12 : vector<8x32xf32>
    %c0_11 = arith.constant 0 : index
    %c0_12 = arith.constant 0 : index
    %14 = vector.load %arg12[%c0_11, %c0_12] : memref<24x32xf32, #tpu.memory_space<vmem>>, vector<24x32xf32>
    %cst_13 = arith.constant dense<0.000000e+00> : vector<8x24xf32>
    %15 = tpu.matmul %13, %14, %cst_13 {dimension_numbers = #tpu.dot_dimension_numbers<[1], [1], [0], [0], [0, 0, 1, 0], [], []>} : vector<8x32xf32>, vector<24x32xf32>, vector<8x24xf32> -> vector<8x24xf32>
    %c0_i32_14 = arith.constant 0 : i32
    %16 = arith.cmpi eq, %arg1, %c0_i32_14 : i32
    %17 = arith.extui %16 : i1 to i32
    %c0_i32_15 = arith.constant 0 : i32
    %18 = arith.cmpi ne, %17, %c0_i32_15 : i32
    scf.if %18 {
      %cst_17 = arith.constant dense<0xFF800000> : vector<24xf32>
      %22 = vector.multi_reduction <maximumf>, %15, %cst_17 [0] : vector<8x24xf32> to vector<24xf32>
      %23 = vector.shape_cast %22 : vector<24xf32> to vector<1x24xf32>
      %c0_18 = arith.constant 0 : index
      %c0_19 = arith.constant 0 : index
      %24 = vector.load %arg13[%c0_18, %c0_19] : memref<1x24xf32, #tpu.memory_space<vmem>>, vector<1x24xf32>
      %25 = arith.maximumf %24, %23 : vector<1x24xf32>
      %c0_20 = arith.constant 0 : index
      %c0_21 = arith.constant 0 : index
      %26 = vector.load %arg14[%c0_20, %c0_21] : memref<1x24xf32, #tpu.memory_space<vmem>>, vector<1x24xf32>
      %c0_22 = arith.constant 0 : index
      %c0_23 = arith.constant 0 : index
      %27 = vector.load %arg13[%c0_22, %c0_23] : memref<1x24xf32, #tpu.memory_space<vmem>>, vector<1x24xf32>
      %28 = arith.subf %27, %25 : vector<1x24xf32>
      %29 = math.exp %28 : vector<1x24xf32>
      %30 = arith.mulf %26, %29 : vector<1x24xf32>
      %31 = vector.broadcast %25 : vector<1x24xf32> to vector<8x24xf32>
      %32 = arith.subf %15, %31 : vector<8x24xf32>
      %33 = math.exp %32 : vector<8x24xf32>
      %cst_24 = arith.constant dense<0.000000e+00> : vector<24xf32>
      %34 = vector.multi_reduction <add>, %33, %cst_24 [0] : vector<8x24xf32> to vector<24xf32>
      %35 = vector.shape_cast %34 : vector<24xf32> to vector<1x24xf32>
      %36 = arith.addf %30, %35 : vector<1x24xf32>
      %c0_25 = arith.constant 0 : index
      %c0_26 = arith.constant 0 : index
      %37 = vector.load %arg14[%c0_25, %c0_26] : memref<1x24xf32, #tpu.memory_space<vmem>>, vector<1x24xf32>
      tpu.vector_store %arg14[%c0_25, %c0_26], %36 {strides = array<i32>} : memref<1x24xf32, #tpu.memory_space<vmem>>, vector<1x24xf32>,
      %c0_27 = arith.constant 0 : index
      %c0_28 = arith.constant 0 : index
      %38 = vector.load %arg13[%c0_27, %c0_28] : memref<1x24xf32, #tpu.memory_space<vmem>>, vector<1x24xf32>
      tpu.vector_store %arg13[%c0_27, %c0_28], %25 {strides = array<i32>} : memref<1x24xf32, #tpu.memory_space<vmem>>, vector<1x24xf32>,
    } else {
    }
    %c1_i32 = arith.constant 1 : i32
    %19 = arith.cmpi eq, %arg1, %c1_i32 : i32
    %20 = arith.extui %19 : i1 to i32
    %c0_i32_16 = arith.constant 0 : i32
    %21 = arith.cmpi ne, %20, %c0_i32_16 : i32
    scf.if %21 {
      %cst_17 = arith.constant dense<0xFF800000> : vector<8xf32>
      %22 = vector.multi_reduction <maximumf>, %15, %cst_17 [1] : vector<8x24xf32> to vector<8xf32>
      %23 = vector.shape_cast %22 : vector<8xf32> to vector<8x1xf32>
      %24 = vector.broadcast %23 : vector<8x1xf32> to vector<8x24xf32>
      %25 = arith.subf %15, %24 : vector<8x24xf32>
      %26 = math.exp %25 : vector<8x24xf32>
      %cst_18 = arith.constant dense<0.000000e+00> : vector<8xf32>
      %27 = vector.multi_reduction <add>, %26, %cst_18 [1] : vector<8x24xf32> to vector<8xf32>
      %28 = vector.shape_cast %27 : vector<8xf32> to vector<8x1xf32>
      %29 = math.log %28 : vector<8x1xf32>
      %30 = arith.addf %23, %29 : vector<8x1xf32>
      %c0_19 = arith.constant 0 : index
      %c0_20 = arith.constant 0 : index
      %31 = vector.load %arg13[%c0_19, %c0_20] : memref<1x24xf32, #tpu.memory_space<vmem>>, vector<1x24xf32>
      %c0_21 = arith.constant 0 : index
      %c0_22 = arith.constant 0 : index
      %32 = vector.load %arg14[%c0_21, %c0_22] : memref<1x24xf32, #tpu.memory_space<vmem>>, vector<1x24xf32>
      %33 = math.log %32 : vector<1x24xf32>
      %34 = arith.addf %31, %33 : vector<1x24xf32>
      %cst_23 = arith.constant 2.000000e+00 : f32
      %35 = vector.broadcast %cst_23 : f32 to vector<8x24xf32>
      %36 = arith.mulf %35, %15 : vector<8x24xf32>
      %37 = vector.broadcast %30 : vector<8x1xf32> to vector<8x24xf32>
      %38 = arith.subf %36, %37 : vector<8x24xf32>
      %39 = vector.broadcast %34 : vector<1x24xf32> to vector<8x24xf32>
      %40 = arith.subf %38, %39 : vector<8x24xf32>
      %c0_24 = arith.constant 0 : index
      %c0_25 = arith.constant 0 : index
      %c0_26 = arith.constant 0 : index
      %41 = vector.load %arg9[%c0_24, %c0_25, %c0_26] : memref<1x8x24xf32, #tpu.memory_space<vmem>>, vector<1x8x24xf32>
      %42 = vector.shape_cast %41 : vector<1x8x24xf32> to vector<8x24xf32>
      %43 = vector.shape_cast %40 : vector<8x24xf32> to vector<1x8x24xf32>
      tpu.vector_store %arg9[%c0_24, %c0_25, %c0_26], %43 {strides = array<i32>} : memref<1x8x24xf32, #tpu.memory_space<vmem>>, vector<1x8x24xf32>,
      %cst_27 = arith.constant dense<0.000000e+00> : vector<8x1xf32>
      %44 = tpu.matmul %10, %2, %cst_27 {dimension_numbers = #tpu.dot_dimension_numbers<[1], [0], [0], [1], [0, 0, 1, 1], [], []>} : vector<8x32xf32>, vector<32x1xf32>, vector<8x1xf32> -> vector<8x1xf32>
      %45 = vector.broadcast %3 : f32 to vector<8x1xf32>
      %46 = arith.addf %44, %45 : vector<8x1xf32>
      %c0_28 = arith.constant 0 : index
      %c0_29 = arith.constant 0 : index
      %c0_30 = arith.constant 0 : index
      %47 = vector.load %arg10[%c0_28, %c0_29, %c0_30] : memref<1x8x1xf32, #tpu.memory_space<vmem>>, vector<1x8x1xf32>
      %48 = vector.shape_cast %47 : vector<1x8x1xf32> to vector<8x1xf32>
      %49 = vector.shape_cast %46 : vector<8x1xf32> to vector<1x8x1xf32>
      tpu.vector_store %arg10[%c0_28, %c0_29, %c0_30], %49 {strides = array<i32>} : memref<1x8x1xf32, #tpu.memory_space<vmem>>, vector<1x8x1xf32>,
    } else {
    }
    return
  }
  func.func @transform_0(%arg0: i32, %arg1: i32, %arg2: i32) -> (i32, i32, i32) {
    %c0_i32 = arith.constant 0 : i32
    %c0_i32_0 = arith.constant 0 : i32
    return %arg0, %arg2, %c0_i32 : i32, i32, i32
  }
  func.func @transform_1(%arg0: i32, %arg1: i32, %arg2: i32) -> (i32, i32, i32) {
    %c0_i32 = arith.constant 0 : i32
    %c0_i32_0 = arith.constant 0 : i32
    %c0_i32_1 = arith.constant 0 : i32
    return %arg0, %c0_i32, %c0_i32_0 : i32, i32, i32
  }
  func.func @transform_2(%arg0: i32, %arg1: i32, %arg2: i32) -> (i32, i32) {
    %c0_i32 = arith.constant 0 : i32
    %c0_i32_0 = arith.constant 0 : i32
    %c0_i32_1 = arith.constant 0 : i32
    return %c0_i32, %c0_i32_0 : i32, i32
  }
  func.func @transform_3(%arg0: i32, %arg1: i32, %arg2: i32) -> (i32, i32) {
    %c0_i32 = arith.constant 0 : i32
    %c0_i32_0 = arith.constant 0 : i32
    %c0_i32_1 = arith.constant 0 : i32
    return %c0_i32, %c0_i32_0 : i32, i32
  }
  func.func @transform_4(%arg0: i32, %arg1: i32, %arg2: i32) -> (i32, i32) {
    %c0_i32 = arith.constant 0 : i32
    %c0_i32_0 = arith.constant 0 : i32
    %c0_i32_1 = arith.constant 0 : i32
    return %c0_i32, %c0_i32_0 : i32, i32
  }
  func.func @transform_5(%arg0: i32, %arg1: i32, %arg2: i32) -> i32 {
    %c0_i32 = arith.constant 0 : i32
    %c0_i32_0 = arith.constant 0 : i32
    return %c0_i32 : i32
  }
  func.func @transform_6(%arg0: i32, %arg1: i32, %arg2: i32) -> (i32, i32, i32) {
    %0 = arith.muli %arg1, %arg2 : i32
    %c0_i32 = arith.constant 0 : i32
    %c0_i32_0 = arith.constant 0 : i32
    return %arg0, %0, %c0_i32 : i32, i32, i32
  }
  func.func @transform_7(%arg0: i32, %arg1: i32, %arg2: i32) -> (i32, i32, i32) {
    %0 = arith.muli %arg1, %arg2 : i32
    %c0_i32 = arith.constant 0 : i32
    %c0_i32_0 = arith.constant 0 : i32
    return %arg0, %0, %c0_i32 : i32, i32, i32
  }
  func.func @transform_8(%arg0: i32, %arg1: i32, %arg2: i32) -> (i32, i32, i32) {
    %c0_i32 = arith.constant 0 : i32
    %c0_i32_0 = arith.constant 0 : i32
    %c0_i32_1 = arith.constant 0 : i32
    return %arg0, %c0_i32, %c0_i32_0 : i32, i32, i32
  }
}

</mosaic_0001>

<bundles_post_ra>
// kernel: tpu_custom_call.1
= control target key start
LH: loop header
LB: loop body
LE: loop exit
PB: predicated region body
PF: predicated region fallthrough
CT: control target
= control target key end

     0   :  { %s2173_s0 = inlined_call_operand.vmem [shape: f32[2,16,32], index: 0, kind: input, shape index: {}]   ;;  %s2174_s1 = inlined_call_operand.hbm [shape: f32[2,24,32], index: 1, kind: input, shape index: {}]   ;;  %s2175_s2 = inlined_call_operand.hbm [shape: f32[32,32], index: 2, kind: input, shape index: {}]   ;;  %s2176_s3 = inlined_call_operand.vmem [shape: f32[1,32], index: 3, kind: input, shape index: {}]   ;;  %s2177_s4 = inlined_call_operand.vmem [shape: f32[32,1], index: 4, kind: input, shape index: {}]   ;;  %s2178_s5 = inlined_call_operand.<no memory space> [shape: f32[1], index: 5, kind: input, shape index: {}]   ;;  %s2179_s6 = inlined_call_operand.hbm [shape: f32[2,16,24], index: 6, kind: output, shape index: {0}]   ;;  %s2180_s7 = inlined_call_operand.vmem [shape: f32[2,16,1], index: 7, kind: output, shape index: {1}]   ;;  %s2181_s8 = inlined_call_operand.vmem [shape: f32[2,24,1], index: 8, kind: output, shape index: {2}]  }
   0x1   :  { %2204 = sst [smem:[#allocation27_spill]] %s2173_s0 }
   0x2   :  { %2205 = sst [smem:[#allocation28_spill]] %s2174_s1 }
   0x3   :  { %2206 = sst [smem:[#allocation29_spill]] %s2175_s2 }
   0x4   :  { %2207 = sst [smem:[#allocation30_spill]] %s2177_s4 }
   0x5   :  { %2208 = sst [smem:[#allocation31_spill]] %s2179_s6 }
   0x6   :  { %2209 = sst [smem:[#allocation32_spill]] %s2180_s7 }
   0x7   :  { %2210 = sst [smem:[#allocation33_spill]] %s2181_s8 }
   0x8   :  { %14 = sst [smem:[#allocation5]] %s2178_s5 }
   0x9   :  { %15 = vsyncpa [#allocation7], 0 }
   0xa   :  { %17 = vsyncpa [#allocation7 + $0x1], 0 }
   0xb   :  { %18 = vsyncpa [#allocation10], 0 }
   0xc   :  { %19 = vsyncpa [#allocation8], 0 }
   0xd   :  { %21 = vsyncpa [#allocation8 + $0x1], 0  ;;  %s1739_s29 = smov 0   ;;  %s1741_s30 = smov 0  }
   0xe   :  { %s1743_s9 = smov 0   ;;  %s1745_s10 = smov 0  }
   0xf   :  { %s1747_s11 = smov 0   ;;  %s1749_s12 = smov 0  }
  0x10   :  { %s1751_s13 = smov 0   ;;  %s1753_s5 = smov 0  }
  0x11   :  { %s1755_s14 = smov 0   ;;  %s1757_s15 = smov 0  }
  0x12   :  { %s1759_s16 = smov 0   ;;  %s1761_s17 = smov 0  }
  0x13   :  { %s1763_s18 = smov 0  }
  0x14 LB: > { %2211 = sst [smem:[#allocation15_spill]] %s1626_s29  ;;  %s1165_s19 = sadd.s32 4294967295, %s1674_s18   ;;  %s1674_s18 = sphi %s1763_s18, %s27_s18   ;;  %s1670_s17 = sphi %s1761_s17, %s2261_s17   ;;  %s1666_s16 = sphi %s1759_s16, %s2260_s16   ;;  %s1662_s15 = sphi %s1757_s15, %s2259_s15   ;;  %s1658_s14 = sphi %s1755_s14, %s2258_s14   ;;  %s1654_s5 = sphi %s1753_s5, %s2266_s5   ;;  %s1650_s13 = sphi %s1751_s13, %s2256_s13   ;;  %s1646_s12 = sphi %s1749_s12, %s2255_s12   ;;  %s1642_s11 = sphi %s1747_s11, %s2254_s11   ;;  %s1638_s10 = sphi %s1745_s10, %s2253_s10   ;;  %s1634_s9 = sphi %s1743_s9, %s2265_s9   ;;  %s1630_s30 = sphi %s1741_s30, %s2264_s30   ;;  %s1626_s29 = sphi %s1739_s29, %s2263_s29  }
  0x15   : > { %2212 = sst [smem:[#allocation16_spill]] %s1642_s11  ;;  %s1166_s20 = sadd.s32 4294967294, %s1674_s18  }
  0x16   : > { %2213 = sst [smem:[#allocation17_spill]] %s1646_s12  ;;  %p94_p0 = scmp.ne.s32.totalorder %s1642_s11, %s1638_s10 }
  0x17   : > { %2214 = sst [smem:[#allocation18_spill]] %s1662_s15  ;;  %p1805_p1 = scmp.eq.s32.totalorder %s1165_s19, 0 }
  0x18   : > { %2215 = sst [smem:[#allocation19_spill]] %s1666_s16  ;;  %p205_p2 = scmp.ne.s32.totalorder %s1634_s9, %s1630_s30 }
  0x19   : > { %2216 = sst [smem:[#allocation20_spill]] %s1670_s17  ;;  %p1814_p3 = por %p1805_p1, %p94_p0 }
  0x1a   : > { %s2217_s21 = scalar_select %p1805_p1, 1, 0 }
  0x1b   : > { %s2218_s23 = scalar_select %p1814_p3, 1, 0 }
  0x1c   : > { %p206_p4 = scmp.eq.s32.totalorder %s1165_s19, 7  ;;  %p211_p5 = scmp.ne.s32.totalorder %s1630_s30, %s1626_s29 }
  0x1d   : > { %p212_p6 = scmp.eq.s32.totalorder %s1166_s20, 7  ;;  %p1167_p8 = scmp.ge.s32.totalorder %s1674_s18, 1 }
  0x1e   : > { %p1820_p7 = por %p206_p4, %p205_p2  ;;  %p275_p10 = scmp.lt.s32.totalorder %s1674_s18, 9 }
  0x1f   : > { %p1825_p9 = por %p212_p6, %p211_p5  ;;  %s1676_s27 = smov [#allocation9]  }
  0x20   : > { %s2219_s24 = scalar_select %p1820_p7, 1, 0 }
  0x21   : > { %s2221_s25 = scalar_select %p1825_p9, 1, 0 }
  0x22   : > { %2220 = sst [smem:[#allocation21_spill]] %s2219_s24  ;;  %p1830_p11 = pnand %p1167_p8, %p275_p10 }
  0x23   : > { %2222 = sst [smem:[#allocation22_spill]] %s2221_s25  ;;  %s287_s28 = sshll.u32 %s1676_s27, 4  ;;  %s288_s28 = int_to_ptr.vmem [resolvable:$true] %s287_s28 }
  0x24   : > { %s2223_s26 = scalar_select %p1830_p11, 1, 0 }
  0x25   : > { %p1331_p12 = pneg %p1830_p11  ;;  %s2225_s2 = sld [smem:[#allocation29_spill]] }
  0x27   : > { %p1838_p13 = pnand %p1331_p12, %p1805_p1 }
  0x29   : > { %p1476_p2 = pneg %p1838_p13 }
  0x2b   : > { %s1474_s22 = scalar_lea.hbm %s2225_s2, 512 }
  0x2c   : > { %p1475_p0 = scmp.ne.s32.totalorder %s2225_s2, %s1474_s22  ;;  %p1481_p6 = scmp.lt.u32.totalorder %s1474_s22, %s2225_s2 }
  0x2e   : > { %p1477_p4 = pnand %p1476_p2, %p1475_p0 }
  0x30   : > { %p1478_p5 = pneg %p1477_p4 }
  0x32   : > { %p1483_p8 = pnand %p1481_p6, %p1478_p5 }
  0x34   : > { %1486 = shalt.err (!%p1483_p8)
}
  0x35   : > { %s1487_s24 = scalar_lea.vmem %s288_s28, 512  ;;  %p1495_p7 = scmp.lt.s32.totalorder %s288_s28, %s288_s28 }
  0x36   : > { %p1488_p10 = scmp.ne.s32.totalorder %s288_s28, %s1487_s24  ;;  %p1496_p1 = scmp.lt.s32.totalorder %s1487_s24, %s1487_s24 }
  0x38   : > { %p1490_p12 = pnand %p1488_p10, %p1476_p2  ;;  %p1497_p3 = por %p1496_p1, %p1495_p7 }
  0x3a   : > { %p1491_p9 = pneg %p1490_p12 }
  0x3c   : > { %p1498_p11 = pnand %p1497_p3, %p1491_p9 }
  0x3e   : > { %1501 = shalt.err (!%p1498_p11)
}
  0x3f   : > { %s2192_s29 = smov 128   ;;  %s2193_s6 = smov 8  }
  0x40   : > { %1334 = dma.hbm_to_vmem [thread:$0]  (!%p1838_p13), %s2225_s2, 512, %s288_s28, [#allocation10], %s2192_s29, %s2192_s29, %s2193_s6  }
  0x41   : > { %s39_s25 = sadd.s32 1, %s1662_s15  ;;  %s42_s19 = sadd.s32 1, %s1666_s16 }
  0x42   : > { %p40_p1 = scmp.ge.s32.totalorder %s39_s25, 2  ;;  %s46_s20 = sadd.s32 1, %s1670_s17 }
  0x43   : > { %s81_s27 = sadd.s32 1, %s1646_s12  ;;  %p88_p3 = scmp.ne.s32.totalorder %s1646_s12, %s1642_s11 }
  0x44   : > { %s2268_s25 = smov (%p40_p1, %s39_s25), 0  ;;  %s2270_s19 = smov (!%p40_p1, %s42_s19), %s1666_s16 }
  0x45   : > { %2226 = sst [smem:[#allocation23_spill]] %s2268_s25  ;;  %p89_p7 = scmp.eq.s32.totalorder %s1674_s18, 0 }
  0x46   : > { %p44_p9 = scmp.ge.s32.totalorder %s2270_s19, 2  ;;  %s188_s10 = smul.u32 %s1662_s15, %s1666_s16 }
  0x47   : > { %p1873_p11 = por %p89_p7, %p88_p3  ;;  %p1344_p13 = scmp.lt.s32.totalorder %s1674_s18, 8 }
  0x48   : > { %s2272_s19 = smov (%p44_p9, %s2270_s19), 0  ;;  %s2274_s20 = smov (!%p44_p9, %s46_s20), %s1670_s17 }
  0x49   : > { %2228 = sst [smem:[#allocation24_spill]] %s2272_s19  ;;  %s189_s28 = smul.u32 %s2272_s19, %s2268_s25 }
  0x4a   : > { %s321_s24 = sand.u32 1, %s1646_s12   ;;  %p48_p0 = scmp.ge.s32.totalorder %s2274_s20, 2 }
  0x4b   : > { %s191_s29 = ssub.s32 %s188_s10, %s189_s28  ;;  %s1319_s6 = smul.u32 24, %s321_s24 }
  0x4c   : > { %s2276_s20 = smov (%p48_p0, %s2274_s20), 0  ;;  %s1320_s2 = smul.u32 384, %s1670_s17 }
  0x4d   : > { %2229 = sst [smem:[#allocation25_spill]] %s2276_s20  ;;  %s78_s16 = ssub.s32 %s1670_s17, %s2276_s20 }
  0x4e   : > { %s325_s15 = scalar_lea.vmem [#allocation6], %s1319_s6  ;;  %p79_p2 = scmp.eq.s32.totalorder %s78_s16, 0 }
  0x4f   : > { %s332_s7 = sshll.u32 %s325_s15, 4  ;;  %s192_s8 = sor.u32 %s191_s29, %s78_s16  ;;  %s1902_s7 = int_to_ptr.vmem [resolvable:$true] %s332_s7 }
  0x50   : > { %p193_p4 = scmp.eq.s32.totalorder %s192_s8, 0  ;;  %s2230_s1 = sld [smem:[#allocation28_spill]] }
  0x51   : > { %s1895_s10 = scalar_select %p79_p2, %s1646_s12, %s81_s27  }
  0x52   : > { %s2232_s28 = sadd.s32 1, %s1634_s9  ;;  %p1908_p5 = pnand %p1344_p13, %p1873_p11 }
  0x53   : > { %2231 = sst [smem:[#allocation26_spill]] %s1895_s10  ;;  %s1912_s0 = scalar_lea.sflag [#allocation7], %s321_s24 }
  0x54   : > { %s1900_s25 = scalar_select %p193_p4, %s1634_s9, %s2232_s28  }
  0x55   : > { %p1504_p8 = pneg %p1908_p5 }
  0x56   : > { %s1892_s19 = scalar_lea.hbm %s2230_s1, %s1320_s2  ;;  %s1507_s16 = scalar_lea.hbm %s2230_s1, 768 }
  0x57   : > { %s1502_s2 = scalar_lea.hbm %s1892_s19, 384  ;;  %p1508_p1 = scmp.lt.u32.totalorder %s1892_s19, %s2230_s1 }
  0x58   : > { %p1503_p6 = scmp.ne.s32.totalorder %s1892_s19, %s1502_s2  ;;  %p1509_p3 = scmp.lt.u32.totalorder %s1507_s16, %s1502_s2 }
  0x59   : > { %p1511_p9 = scmp.lt.u32.totalorder %s1502_s2, %s1892_s19 }
  0x5a   : > { %p1505_p10 = pnand %p1504_p8, %p1503_p6  ;;  %p1510_p7 = por %p1509_p3, %p1508_p1 }
  0x5c   : > { %p1506_p12 = pneg %p1505_p10  ;;  %p1512_p11 = por %p1511_p9, %p1510_p7 }
  0x5e   : > { %p1513_p13 = pnand %p1512_p11, %p1506_p12 }
  0x60   : > { %1516 = shalt.err (!%p1513_p13)
}
  0x61   : > { %s1517_s27 = scalar_lea.vmem %s1902_s7, 384  ;;  %s1679_s22 = smov [#allocation6]  }
  0x62   : > { %p1518_p0 = scmp.ne.s32.totalorder %s1902_s7, %s1517_s27  ;;  %s1522_s24 = sshll.u32 %s1679_s22, 4  ;;  %s1523_s24 = int_to_ptr.vmem [resolvable:$false] %s1522_s24 }
  0x63   : > { %s1524_s28 = scalar_lea.vmem %s1523_s24, 768  ;;  %p1525_p6 = scmp.lt.s32.totalorder %s1902_s7, %s1523_s24 }
  0x64   : > { %p1520_p2 = pnand %p1518_p0, %p1504_p8  ;;  %p1526_p10 = scmp.lt.s32.totalorder %s1524_s28, %s1517_s27 }
  0x66   : > { %p1521_p4 = pneg %p1520_p2  ;;  %p1527_p1 = por %p1526_p10, %p1525_p6 }
  0x68   : > { %p1528_p3 = pnand %p1527_p1, %p1521_p4 }
  0x6a   : > { %1531 = shalt.err (!%p1528_p3)
}
  0x6b   : > { %s2234_s2 = smov 8   ;;  %s2235_s4 = smov 128  }
  0x6c   : > { %1338 = dma.hbm_to_vmem [thread:$0]  (!%p1908_p5), %s1892_s19, 384, %s1902_s7, %s1912_s0, %s2235_s4, %s2235_s4, %s2234_s2  }
  0x6d   : > { %p2236_p8 = scmp.ne.s32.totalorder %s2223_s26, 0 }
  0x6e   : > { %s346_s15 = sand.u32 (!%p2236_p8), 1, %s1642_s11   ;;  %p2237_p12 = scmp.ne.s32.totalorder (!%p2236_p8), %s2218_s23, 0 }
  0x6f   : > { %344 = sbr.rel (%p2236_p8) target bundleno = 1204 (0x4b4), region = 44  ;;  %s347_s29 = scalar_lea.sflag (!%p2236_p8), [#allocation7], %s346_s15 }
  0x70   : > { %s1321_s16 = smul.u32 (!%p2236_p8), 24, %s346_s15 }
  0x72   : > { %s1946_s6 = scalar_lea.vmem (!%p2236_p8), [#allocation6], %s1321_s16 }
  0x76   : > { %1613 = dma.done.wait (%p2237_p12), %s347_s29, 384  }
  0x77   : > { %1615 = vsyncadd (%p2237_p12), %s347_s29, 4294966912  ;;  %p2238_p7 = scmp.ne.s32.totalorder %s2217_s21, 0 }
  0x79   : > { %1617 = dma.done.wait (%p2238_p7), [#allocation10], 512  }
  0x7a   : > { %1619 = vsyncadd (%p2238_p7), [#allocation10], 4294966784  ;;  %s2199_s7 = sand.u32 1, %s1630_s30   ;;  %p409_p5 = scmp.lt.s32.totalorder %s1658_s14, 1  ;;  %v1971_v0 = vld [vmem:[#allocation9] sm:$0xff]  ;;  %v1973_v1 = vld [vmem:[#allocation9 + $0x8] sm:$0xff] }
  0x7b   : > { %s1958_s26 = sld [smem:[#allocation5]]  ;;  %s1962_s23 = sshll.u32 %s2199_s7, 3  ;;  %v1975_v2 = vld [vmem:[#allocation9 + $0x10] sm:$0xff]  ;;  %v1978_v3 = vld [vmem:[#allocation9 + $0x18] sm:$0xff] }
  0x7c   : > { %p411_p9 = scmp.lt.s32.totalorder %s1650_s13, 1  ;;  %s1969_s0 = smul.u32 %s1650_s13, %s1654_s5  ;;  %v1983_v4 = vld [vmem:[%s2176_s3] sm:$0x1] }
  0x7d   : > { %s410_s19 = scalar_select %p409_p5, %s1658_s14, 1 }
  0x7e   : > { %s412_s8 = scalar_select %p411_p9, %s1650_s13, 1 }
  0x7f   : > { %s1174_s21 = sshll.u32 %s410_s19, 1  ;;  %s1322_s22 = smul.u32 24, %s410_s19 }
  0x80   : > { %s414_s27 = sadd.s32 %s1174_s21, %s412_s8  ;;  %p421_p11 = scmp.lt.s32.totalorder %s1969_s0, 1 }
  0x81   : > { %s1175_s24 = sshll.u32 %s414_s27, 3  ;;  %s2239_s16 = sld [smem:[#allocation30_spill]] }
  0x82   : > { %s2241_s7 = sld [smem:[#allocation27_spill]]  ;;  %s2242_s17 = sld [smem:[#allocation33_spill]] }
  0x83   : > { %p443_p13 = scmp.eq.s32.totalorder %s1654_s5, 0  ;;  %p444_p0 = scmp.eq.s32.totalorder %s1650_s13, 0 }
  0x84   : > { %s2243_s12 = sld [smem:[#allocation32_spill]] }
  0x85   : > { %p445_p2 = pnand %p444_p0, %p443_p13 }
  0x86   : > { %v1292_v9 = vpack.c.bf16 (!%p445_p2), %v1973_v1, %v1971_v0  ;;  %v1680_v11 = vmov (!%p445_p2), 0.0|0.0   ;;  %vm551_vm0 = vcmask (!%p445_p2), 188416   ;;  %v1295_v12 = vpack.c.bf16 (!%p445_p2), %v1978_v3, %v1975_v2  ;;  %v449_v16 = vld [vmem:[%s1946_s6] sm:$0xff] (!%p445_p2)  ;;  %v450_v17 = vld [vmem:[%s1946_s6 + $0x8] sm:$0xff] (!%p445_p2)  ;;  %v451_v18 = vld [vmem:[%s1946_s6 + $0x10] sm:$0xff] (!%p445_p2) }
  0x87   : > { %s2240_s19 = smov %s2239_s16  ;;  %v1988_v5 = vld [vmem:[%s2239_s16] sm:$0xff]  ;;  %s390_s16 = scalar_lea.vmem [#allocation11], %s1962_s23  ;;  %1291 = vmatprep.subr.bf16.mxu0 (!%p445_p2), %v1680_v11  ;;  %1297 = vmatprep.subr.bf16.mxu1 (!%p445_p2), %v1680_v11  ;;  %v1681_v14 = vmov (!%p445_p2), 0.0   ;;  %v1682_v15 = vmov (!%p445_p2), -inf   ;;  %vm1683_vm1 = vmmov (!%p445_p2), 0   ;;  %vm458_vm2 = vcmask (!%p445_p2), 261120  }
  0x88   : > { %s1993_s1 = scalar_lea.vmem %s2241_s7, %s1175_s24  ;;  %s1998_s10 = scalar_lea.vmem %s2242_s17, %s1322_s22  ;;  %v2003_v6 = vld [vmem:[%s2240_s19 + $0x8] sm:$0xff]  ;;  %v2008_v7 = vld [vmem:[%s2240_s19 + $0x10] sm:$0xff]  ;;  %v2013_v8 = vld [vmem:[%s2240_s19 + $0x18] sm:$0xff]  ;;  %1293 = vmatpush3.bf16.msra.mxu0 (!%p445_p2), %v1292_v9  ;;  %553 = vst.msk [vmem:[#allocation4] sm:$0x1] (!%p445_p2), %vm551_vm0, %v1681_v14  ;;  %1234 = vmatprep.mubr.msk.f32.mxu0 (!%p445_p2), %vm1683_vm1, %v1681_v14  ;;  %v453_v19 = vlaneseq (!%p445_p2)  ;;  %v554_v23 = vstv (!%p445_p2), %s1958_s26  ;;  %vm635_vm3 = vcmask (!%p445_p2), 7168  }
  0x89   : > { %s422_s7 = scalar_select %p421_p11, %s1969_s0, 1 }
  0x8a   : > { %448 = sbr.rel (%p445_p2) target bundleno = 370 (0x172), region = 56  ;;  %v1298_v10 = vpack.c.bf16 (!%p445_p2), %v2003_v6, %v1988_v5  ;;  %v1301_v13 = vpack.c.bf16 (!%p445_p2), %v2013_v8, %v2008_v7  ;;  %1294 = vmatprep.subr.bf16.mxu0 (!%p445_p2), %v1680_v11  ;;  %552 = vst.msk [vmem:[#allocation3] sm:$0x1] (!%p445_p2), %vm551_vm0, %v1682_v15  ;;  %1251 = vmatprep.mubr.msk.f32.mxu1 (!%p445_p2), %vm1683_vm1, %v1681_v14  ;;  %v454_v20 = vshrl.u32 (!%p445_p2), %v453_v19, 7 }
  0x8b   : > { %s424_s17 = sadd.s32 %s1174_s21, %s422_s7 }
  0x8c   : > { %s1177_s20 = sshll.u32 %s424_s17, 3  ;;  %1299 = vmatpush3.bf16.msra.mxu1 (!%p445_p2), %v1298_v10  ;;  %1296 = vmatpush3.bf16.msra.mxu0 (!%p445_p2), %v1295_v12  ;;  %v455_v21 = vsub.s32 (!%p445_p2), 0, %v454_v20 }
  0x8d   : > { %s2021_s24 = scalar_lea.vmem %s2243_s12, %s1177_s20  ;;  %1300 = vmatprep.subr.bf16.mxu1 (!%p445_p2), %v1680_v11 }
  0x8e   : > { %v456_v22 = vrot.slane (!%p445_p2), %v1983_v4, %v455_v21 }
  0x8f   : > { %1235 = vmatmul.mubr.msk.f32.vlgmr.msra.gmra.mrb[0].mxu0 (!%p445_p2), %vm458_vm2, %v449_v16 }
  0x90   : > { %1302 = vmatpush3.bf16.msra.mxu1 (!%p445_p2), %v1301_v13  ;;  %1237 = vmatprep.mubr.msk.f32.mxu0 (!%p445_p2), %vm1683_vm1, %v1681_v14 }
  0x93   : > { %1252 = vmatmul.mubr.msk.f32.vlgmr.msra.gmra.mrb[0].mxu1 %vm458_vm2, %v449_v16  ;;  %1238 = vmatmul.mubr.msk.f32.gmra.mrb[2].mxu0 %vm458_vm2, %v450_v17 }
  0x94   : > { %1254 = vmatprep.mubr.msk.f32.mxu1 %vm1683_vm1, %v1681_v14  ;;  %1240 = vmatprep.mubr.msk.f32.mxu0 %vm1683_vm1, %v1681_v14 }
  0x97   : > { %1255 = vmatmul.mubr.msk.f32.gmra.mrb[2].mxu1 %vm458_vm2, %v450_v17  ;;  %1241 = vmatmul.mubr.msk.f32.gmra.mrb[4].mxu0 %vm458_vm2, %v451_v18 }
  0x98   : > { %1257 = vmatprep.mubr.msk.f32.mxu1 %vm1683_vm1, %v1681_v14 }
  0x9b   : > { %1258 = vmatmul.mubr.msk.f32.gmra.mrb[4].mxu1 %vm458_vm2, %v451_v18 }
 0x162   : > { %v534_v24 = vpop.f32.mrb[0].mxu0 }
 0x163   : > { %v535_v26 = vadd.f32 %v534_v24, %v456_v22  ;;  %v1236_v28 = vpop.f32.mrb[1].mxu0 }
 0x165   : > { %548 = vst.msk [vmem:[#allocation2] sm:$0xff] %vm458_vm2, %v535_v26 }
 0x166   : > { %v621_v25 = vpop.f32.mrb[0].mxu1  ;;  %v539_v30 = vpop.f32.mrb[2].mxu0 }
 0x167   : > { %v622_v27 = vadd.f32 %v621_v25, %v554_v23  ;;  %v1253_v29 = vpop.f32.mrb[1].mxu1  ;;  %v540_v32 = vadd.f32 %v539_v30, %v456_v22  ;;  %v1239_v34 = vpop.f32.mrb[3].mxu0 }
 0x169   : > { %636 = vst.msk [vmem:[%s1998_s10] sm:$0xff] %vm635_vm3, %v622_v27 }
 0x16a   : > { %v626_v31 = vpop.f32.mrb[2].mxu1  ;;  %549 = vst.msk [vmem:[#allocation2 + $0x8] sm:$0xff] %vm458_vm2, %v540_v32  ;;  %v544_v36 = vpop.f32.mrb[4].mxu0 }
 0x16b   : > { %v627_v33 = vadd.f32 %v626_v31, %v554_v23  ;;  %v1256_v35 = vpop.f32.mrb[3].mxu1  ;;  %v545_v38 = vadd.f32 %v544_v36, %v456_v22  ;;  %v1242_v40 = vpop.f32.mrb[5].mxu0 }
 0x16d   : > { %637 = vst.msk [vmem:[%s1998_s10 + $0x8] sm:$0xff] %vm635_vm3, %v627_v33 }
 0x16e   : > { %v631_v37 = vpop.f32.mrb[4].mxu1  ;;  %550 = vst.msk [vmem:[#allocation2 + $0x10] sm:$0xff] %vm458_vm2, %v545_v38 }
 0x16f   : > { %v632_v39 = vadd.f32 %v631_v37, %v554_v23  ;;  %v1259_v41 = vpop.f32.mrb[5].mxu1 }
 0x171   : > { %638 = vst.msk [vmem:[%s1998_s10 + $0x10] sm:$0xff] %vm635_vm3, %v632_v39 }
 0x172 PF: > { %v1304_v42 = vpack.c.bf16 %v1973_v1, %v1971_v0  ;;  %v720_v43 = vld [vmem:[#allocation2] sm:$0xff]  ;;  %v721_v44 = vld [vmem:[#allocation2 + $0x8] sm:$0xff]  ;;  %v1684_v45 = vmov 0.0|0.0   ;;  %vm646_vm4 = vcmask 261120   ;;  %v1307_v47 = vpack.c.bf16 %v1978_v3, %v1975_v2  ;;  %p1190_p4 = scmp.ne.s32.totalorder %s1654_s5, 0 }
 0x173   : > { %1303 = vmatprep.subr.bf16.mxu0 %v1684_v45  ;;  %1309 = vmatprep.subr.bf16.mxu1 %v1684_v45  ;;  %v1310_v46 = vpack.c.bf16 %v721_v44, %v720_v43  ;;  %vm1685_vm5 = vmmov 0   ;;  %v1686_v48 = vmov 0.0   ;;  %vm1311_vm6 = vmpackc.low %vm646_vm4, %vm646_vm4  ;;  %v2059_v49 = vld [vmem:[%s1993_s1] sm:$0xff]  ;;  %v641_v51 = vlaneseq  ;;  %v816_v2 = vld [vmem:[#allocation3] sm:$0x1] (!%p1190_p4) }
 0x174   : > { %1305 = vmatpush3.bf16.msra.mxu0 %v1304_v42  ;;  %1268 = vmatprep.mubr.msk.f32.mxu0 %vm1685_vm5, %v1686_v48  ;;  %vm808_vm7 = vcmask (!%p1190_p4), 195584   ;;  %vm840_vm8 = vcmask (!%p1190_p4), 188416   ;;  %v818_v20 = vld [vmem:[#allocation4] sm:$0x1] (!%p1190_p4) }
 0x175   : > { %1306 = vmatprep.subr.bf16.mxu0 %v1684_v45  ;;  %1312 = vmatpush3.bf16.xpose.msk.msra.mxu1 %vm1311_vm6, %v1310_v46  ;;  %v722_v50 = vld [vmem:[#allocation2 + $0x10] sm:$0xff]  ;;  %v642_v52 = vshrl.u32 %v641_v51, 7 }
 0x176   : > { %1275 = vmatprep.subr.mxu1 %v1686_v48  ;;  %1277 = vmatprep.mubr.msk.f32.mxu1 %vm1685_vm5, %v1686_v48 }
 0x177   : > { %v2064_v53 = vsub.s32 0, %v642_v52 }
 0x178   : > { %1308 = vmatpush3.bf16.msra.mxu0 %v1307_v47 }
 0x179   : > { %v644_v54 = vrot.slane %v1983_v4, %v2064_v53 }
 0x17b   : > { %1269 = vmatmul.mubr.msk.f32.vlgmr.msra.gmra.mrb[0].mxu0 %vm646_vm4, %v2059_v49 }
 0x17d   : > { %1276 = vmatpush3.xpose.msk.msra.mxu1 %vm646_vm4, %v722_v50 }
 0x24e   : > { %v716_v55 = vpop.f32.mrb[0].mxu0 }
 0x24f   : > { %v717_v56 = vadd.f32 %v716_v55, %v644_v54  ;;  %v1270_v57 = vpop.f32.mrb[1].mxu0 }
 0x251   : > { %1278 = vmatmul.mubr.msk.f32.vlgmr.msra.gmra.mrb[0].mxu1 %vm646_vm4, %v717_v56 }
 0x31f   : > { %807 = sbr.rel (%p1190_p4) target bundleno = 853 (0x355), region = 60 }
 0x324   : > { %v2069_v58 = vpop.f32.mrb[0].mxu1 }
 0x325   : > { %v1279_v59 = vpop.f32.mrb[1].mxu1  ;;  %v809_v60 = vsel (!%p1190_p4), %vm808_vm7, %v2069_v58, -inf }
 0x326   : > { %v810_v61 = vrot.slane %v809_v60, 4 }
 0x328   : > { %v811_v62 = vmax.f32 %v809_v60, %v810_v61 }
 0x32a   : > { %v812_v63 = vrot.slane %v811_v62, 2 }
 0x32c   : > { %v813_v0 = vmax.f32 %v811_v62, %v812_v63 }
 0x32e   : > { %v814_v1 = vrot.slane %v813_v0, 1 }
 0x330   : > { %v815_v3 = vmax.f32 %v813_v0, %v814_v1 }
 0x332   : > { %v817_v4 = vmax.f32 %v816_v2, %v815_v3 }
 0x334   : > { %v827_v9 = vrot.slane %v817_v4, %v2064_v53  ;;  %842 = vst.msk [vmem:[#allocation3] sm:$0x1] %vm840_vm8, %v817_v4  ;;  %v819_v12 = vsub.f32 %v816_v2, %v817_v4 }
 0x336   : > { %v829_v10 = vsub.f32 %v2069_v58, %v827_v9  ;;  %v820_v13 = vmul.f32 1.442695, %v819_v12 }
 0x338   : > { %v830_v11 = vmul.f32 1.442695, %v829_v10 }
 0x33a   : > { %1464 = vpow2.f32 %v830_v11 }
 0x33b   : > { %1466 = vpow2.f32 %v820_v13 }
 0x344   : > { %v1465_v14 = vpop.eup %1464 }
 0x345   : > { %v832_v15 = vsel %vm808_vm7, %v1465_v14, 0.0  ;;  %v1467_v19 = vpop.eup %1466 }
 0x346   : > { %v833_v16 = vrot.slane %v832_v15, 4  ;;  %v822_v22 = vmul.f32 %v1467_v19, %v818_v20 }
 0x348   : > { %v834_v17 = vadd.f32 %v833_v16, %v832_v15 }
 0x34a   : > { %v835_v18 = vrot.slane %v834_v17, 2 }
 0x34c   : > { %v836_v21 = vadd.f32 %v835_v18, %v834_v17 }
 0x34e   : > { %v837_v23 = vrot.slane %v836_v21, 1 }
 0x350   : > { %v838_v24 = vadd.f32 %v837_v23, %v836_v21 }
 0x352   : > { %v839_v25 = vadd.f32 %v838_v24, %v822_v22 }
 0x354   : > { %841 = vst.msk [vmem:[#allocation4] sm:$0x1] %vm840_vm8, %v839_v25 }
 0x355 PF: > { %p1191_p6 = scmp.ne.s32.totalorder %s1654_s5, 1 }
 0x356   : > { %vm847_vm9 = vcmask (!%p1191_p6), 195584   ;;  %v1314_v26 = vpack.c.bf16 (!%p1191_p6), %v2003_v6, %v1988_v5  ;;  %v1687_v28 = vmov (!%p1191_p6), 0.0|0.0   ;;  %v1317_v29 = vpack.c.bf16 (!%p1191_p6), %v2013_v8, %v2008_v7  ;;  %v860_v40 = vld [vmem:[#allocation3] sm:$0x1] (!%p1191_p6) }
 0x357   : > { %846 = sbr.rel (%p1191_p6) target bundleno = 1176 (0x498), region = 64  ;;  %v848_v27 = vsel (!%p1191_p6), %vm847_vm9, %v2069_v58, -inf  ;;  %1313 = vmatprep.subr.bf16.mxu0 (!%p1191_p6), %v1687_v28  ;;  %vm1688_vm10 = vmmov (!%p1191_p6), 0   ;;  %v1689_v30 = vmov (!%p1191_p6), 0.0   ;;  %v875_v34 = vstv (!%p1191_p6), %s1958_s26 }
 0x358   : > { %849 = vmax.xlane.f32.xlu0 (!%p1191_p6), %v848_v27  ;;  %1315 = vmatpush3.bf16.msra.mxu0 (!%p1191_p6), %v1314_v26  ;;  %vm946_vm11 = vcmask (!%p1191_p6), 7168   ;;  %v865_v43 = vmul.f32 (!%p1191_p6), 2.0, %v2069_v58 }
 0x359   : > { %1316 = vmatprep.subr.bf16.mxu0 (!%p1191_p6), %v1687_v28  ;;  %1288 = vmatprep.mubr.msk.f32.mxu0 (!%p1191_p6), %vm1688_vm10, %v1689_v30 }
 0x35b   : > { %v861_v36 = vld [vmem:[#allocation4] sm:$0x1] (!%p1191_p6) }
 0x35c   : > { %1318 = vmatpush3.bf16.msra.mxu0 (!%p1191_p6), %v1317_v29 }
 0x35f   : > { %1289 = vmatmul.mubr.msk.f32.vlgmr.msra.gmra.mrb[0].mxu0 %vm646_vm4, %v2059_v49 }
 0x3e5   : > { %v850_v5 = vpop.xlane.xlu0 %849 }
 0x3e6   : > { %v851_v6 = vsub.f32 %v2069_v58, %v850_v5 }
 0x3e8   : > { %v852_v31 = vmul.f32 1.442695, %v851_v6 }
 0x3ea   : > { %1468 = vpow2.f32 %v852_v31 }
 0x3eb   : > { %1470 = vlog2.f32 %v861_v36 }
 0x3f4   : > { %v1469_v32 = vpop.eup %1468 }
 0x3f5   : > { %v854_v33 = vsel %vm847_vm9, %v1469_v32, 0.0  ;;  %v1471_v38 = vpop.eup %1470 }
 0x3f6   : > { %855 = vadd.xlane.f32.xlu0 %v854_v33  ;;  %v863_v39 = vmul.f32 0.6931472, %v1471_v38 }
 0x3f8   : > { %v864_v41 = vadd.f32 %v863_v39, %v860_v40 }
 0x3fa   : > { %v871_v45 = vrot.slane %v864_v41, %v2064_v53 }
 0x432   : > { %v942_v7 = vpop.f32.mrb[0].mxu0 }
 0x433   : > { %v943_v8 = vadd.f32 %v942_v7, %v875_v34  ;;  %v1290_v35 = vpop.f32.mrb[1].mxu0 }
 0x435   : > { %947 = vst.msk [vmem:[%s2021_s24] sm:$0xff] %vm946_vm11, %v943_v8 }
 0x483   : > { %v856_v37 = vpop.xlane.xlu0 %855 }
 0x484   : > { %1472 = vlog2.f32 %v856_v37 }
 0x48e   : > { %v1473_v42 = vpop.eup %1472 }
 0x48f   : > { %v858_v44 = vmul.f32 0.6931472, %v1473_v42 }
 0x491   : > { %v859_v46 = vadd.f32 %v858_v44, %v850_v5 }
 0x493   : > { %v866_v47 = vsub.f32 %v865_v43, %v859_v46 }
 0x495   : > { %v873_v48 = vsub.f32 %v866_v47, %v871_v45 }
 0x497   : > { %874 = vst.msk [vmem:[%s390_s16] sm:$0xff] %vm847_vm9, %v873_v48 }
 0x498 PF: > { %s2244_s1 = sld [smem:[#allocation21_spill]]  ;;  %s1194_s13 = sshll.u32 %s1658_s14, 1 }
 0x499   : > { %s975_s5 = sadd.s32 %s1194_s13, %s1969_s0  ;;  %s979_s10 = sshll.u32 %s390_s16, 4  ;;  %s2101_s10 = int_to_ptr.vmem [resolvable:$true] %s979_s10 }
 0x49a   : > { %s1195_s6 = sshll.u32 %s975_s5, 7  ;;  %s2245_s29 = sld [smem:[#allocation31_spill]] }
 0x49b   : > { %s2247_s28 = sand.u32 1, %s1630_s30   ;;  %s1532_s4 = scalar_lea.vmem %s2101_s10, 128 }
 0x49c   : > { %s949_s2 = scalar_lea.sflag [#allocation8], %s2247_s28  ;;  %p1533_p10 = scmp.ne.s32.totalorder %s2101_s10, %s1532_s4 }
 0x49d   : > { %s1690_s14 = smov [#allocation11]  }
 0x49e   : > { %p2248_p1 = scmp.ne.s32.totalorder %s2244_s1, 0  ;;  %s1536_s23 = sshll.u32 %s1690_s14, 4  ;;  %s1537_s23 = int_to_ptr.vmem [resolvable:$false] %s1536_s23 }
 0x49f   : > { %s1538_s0 = scalar_lea.vmem %s1537_s23, 256  ;;  %p1539_p12 = scmp.lt.s32.totalorder %s2101_s10, %s1537_s23 }
 0x4a0   : > { %s2246_s8 = smov %s2245_s29  ;;  %s977_s27 = scalar_lea.hbm %s2245_s29, %s1195_s6 }
 0x4a1   : > { %p1534_p3 = pnand %p1533_p10, %p2248_p1  ;;  %p1540_p7 = scmp.lt.s32.totalorder %s1538_s0, %s1532_s4 }
 0x4a3   : > { %p1535_p8 = pneg %p1534_p3  ;;  %p1541_p5 = por %p1540_p7, %p1539_p12 }
 0x4a5   : > { %p1542_p9 = pnand %p1541_p5, %p1535_p8 }
 0x4a7   : > { %1545 = shalt.err (!%p1542_p9)
}
 0x4a8   : > { %s1546_s15 = scalar_lea.hbm %s977_s27, 128  ;;  %s1550_s20 = scalar_lea.hbm %s2246_s8, 512 }
 0x4a9   : > { %p1547_p11 = scmp.ne.s32.totalorder %s977_s27, %s1546_s15  ;;  %p1551_p2 = scmp.lt.u32.totalorder %s977_s27, %s2246_s8 }
 0x4aa   : > { %p1552_p4 = scmp.lt.u32.totalorder %s1550_s20, %s1546_s15  ;;  %p1554_p10 = scmp.lt.u32.totalorder %s1546_s15, %s977_s27 }
 0x4ab   : > { %p1548_p13 = pnand %p1547_p11, %p2248_p1 }
 0x4ac   : > { %p1553_p6 = por %p1552_p4, %p1551_p2 }
 0x4ad   : > { %p1549_p0 = pneg %p1548_p13 }
 0x4ae   : > { %p1555_p3 = por %p1554_p10, %p1553_p6 }
 0x4b0   : > { %p1556_p8 = pnand %p1555_p3, %p1549_p0 }
 0x4b2   : > { %1559 = shalt.err (!%p1556_p8)
}
 0x4b3   : > { %1329 = dma.vmem_to_hbm [thread:$0]  (%p2248_p1), %s2101_s10, 128, %s977_s27, %s949_s2  }
 0x4b4 PF: > { %s2249_s12 = sld [smem:[#allocation15_spill]]  ;;  %s2250_s24 = sld [smem:[#allocation22_spill]] }
 0x4b5   : > { %p1346_p12 = scmp.ge.s32.totalorder %s1674_s18, 2 }
 0x4ba   : > { %s998_s16 = sand.u32 1, %s2249_s12   ;;  %p2251_p7 = scmp.ne.s32.totalorder %s2250_s24, 0 }
 0x4bb   : > { %s999_s13 = scalar_lea.sflag [#allocation8], %s998_s16 }
 0x4bc   : > { %p1340_p5 = pnand %p1346_p12, %p2251_p7 }
 0x4be   : > { %1621 = dma.done.wait (!%p1340_p5), %s999_s13, 128  }
 0x4bf   : > { %1623 = vsyncadd (!%p1340_p5), %s999_s13, 4294967168  ;;  %s27_s18 = sadd.s32 1, %s1674_s18   ;;  %s2253_s10 = sld [smem:[#allocation16_spill]] }
 0x4c0   : > { %p2129_p9 = scmp.ge.s32.totalorder %s27_s18, 10   ;;  %s2254_s11 = sld [smem:[#allocation17_spill]] }
 0x4c1   : > { %s2255_s12 = sld [smem:[#allocation26_spill]]  ;;  %s2256_s13 = sld [smem:[#allocation18_spill]] }
 0x4c2   : > { %s2257_s1 = sld [smem:[#allocation19_spill]]  ;;  %s2258_s14 = sld [smem:[#allocation20_spill]] }
 0x4c3   : > { %s2259_s15 = sld [smem:[#allocation23_spill]]  ;;  %s2260_s16 = sld [smem:[#allocation24_spill]] }
 0x4c4   : > { %s2261_s17 = sld [smem:[#allocation25_spill]]  ;;  %s2263_s29 = smov %s1630_s30 }
 0x4c5   : > { %s2264_s30 = smov %s1634_s9  ;;  %s2265_s9 = smov %s1900_s25 }
 0x4c6   :  { %26 = sbr.rel (!%p2129_p9) target bundleno = 20 (0x14), region = 132 }
 0x4c8   : > { %s2266_s5 = smov %s2257_s1 }
 0x4cd   :  { %1024 = vsyncpa [#allocation7], 1 }
 0x4ce   :  { %1026 = vsyncpa [#allocation7 + $0x1], 1 }
 0x4cf   :  { %1027 = vsyncpa [#allocation10], 1 }
 0x4d0   :  { %1028 = vsyncpa [#allocation8], 1 }
 0x4d1   :  { %1030 = vsyncpa [#allocation8 + $0x1], 1 }

</bundles_post_ra>
